<compile_context>
chip_gen: v6e
topology: v6e:2x2x1
jax: 0.10.0
libtpu: 0.0.40
codegen_flags: <defaults>
</compile_context>

<pallas_src>
import functools
import math

import jax
import jax.numpy as jnp
from jax.experimental import pallas as pl
from jax.experimental.pallas import tpu as pltpu


def _pick_tile(dim, candidates):
    """Largest candidate tile that evenly divides `dim`, else the full dim."""
    for c in candidates:
        if dim % c == 0:
            return c
    return dim


# ---------------------------------------------------------------------------
# Tiled matmul kernel (used for the QKV projection and the output projection).
# ---------------------------------------------------------------------------
def _matmul_kernel(a_ref, b_ref, o_ref, acc_ref):
    @pl.when(pl.program_id(2) == 0)
    def _():
        acc_ref[...] = jnp.zeros_like(acc_ref)

    acc_ref[...] += jnp.dot(a_ref[...], b_ref[...],
                            preferred_element_type=jnp.float32)

    @pl.when(pl.program_id(2) == pl.num_programs(2) - 1)
    def _():
        o_ref[...] = acc_ref[...].astype(o_ref.dtype)


def matmul_pallas(a, b):
    """a: (M, K), b: (K, N) -> (M, N)."""
    M, K = a.shape
    K2, N = b.shape
    assert K == K2
    tm = _pick_tile(M, (512, 256, 128))
    tn = _pick_tile(N, (512, 256, 128))
    tk = _pick_tile(K, (512, 256, 128))
    grid = (M // tm, N // tn, K // tk)
    return pl.pallas_call(
        _matmul_kernel,
        out_shape=jax.ShapeDtypeStruct((M, N), a.dtype),
        grid_spec=pltpu.PrefetchScalarGridSpec(
            num_scalar_prefetch=0,
            grid=grid,
            in_specs=[
                pl.BlockSpec((tm, tk), lambda i, j, k: (i, k)),
                pl.BlockSpec((tk, tn), lambda i, j, k: (k, j)),
            ],
            out_specs=pl.BlockSpec((tm, tn), lambda i, j, k: (i, j)),
            scratch_shapes=[pltpu.VMEM((tm, tn), jnp.float32)],
        ),
        compiler_params=pltpu.CompilerParams(
            dimension_semantics=("parallel", "parallel", "arbitrary")),
    )(a, b)


# ---------------------------------------------------------------------------
# Flash-style causal attention kernel (online softmax).
# q, k, v: (B*H, T, Dh)  ->  out: (B*H, T, Dh)
# ---------------------------------------------------------------------------
def _flash_causal_kernel(q_ref, k_ref, v_ref, o_ref, m_sc, l_sc, acc_sc,
                         *, tq, tk, scale):
    qi = pl.program_id(1)
    ki = pl.program_id(2)

    @pl.when(ki == 0)
    def _():
        m_sc[...] = jnp.full_like(m_sc, -jnp.inf)
        l_sc[...] = jnp.zeros_like(l_sc)
        acc_sc[...] = jnp.zeros_like(acc_sc)

    # Skip kv blocks that lie entirely above the causal diagonal.
    @pl.when(ki * tk <= qi * tq + (tq - 1))
    def _():
        q = q_ref[...].astype(jnp.float32)
        k = k_ref[...].astype(jnp.float32)
        s = jnp.einsum("bqd,bkd->bqk", q, k,
                       preferred_element_type=jnp.float32) * scale

        q_ids = qi * tq + jax.lax.broadcasted_iota(jnp.int32, (tq, tk), 0)
        k_ids = ki * tk + jax.lax.broadcasted_iota(jnp.int32, (tq, tk), 1)
        causal = (q_ids >= k_ids)[None, :, :]
        s = jnp.where(causal, s, -1e30)

        m_prev = m_sc[...]
        m_new = jnp.maximum(m_prev, s.max(axis=-1, keepdims=True))
        alpha = jnp.exp(m_prev - m_new)
        p = jnp.exp(s - m_new)

        l_sc[...] = alpha * l_sc[...] + p.sum(axis=-1, keepdims=True)
        acc_sc[...] = alpha * acc_sc[...] + jnp.einsum(
            "bqk,bkd->bqd", p, v_ref[...].astype(jnp.float32),
            preferred_element_type=jnp.float32)
        m_sc[...] = m_new

    @pl.when(ki == pl.num_programs(2) - 1)
    def _():
        o_ref[...] = (acc_sc[...] / l_sc[...]).astype(o_ref.dtype)


def flash_causal_attention(q, k, v):
    BH, T, Dh = q.shape
    tq = _pick_tile(T, (256, 128))
    tk = _pick_tile(T, (128, 256))
    scale = 1.0 / math.sqrt(Dh)
    grid = (BH, T // tq, T // tk)
    kernel = functools.partial(_flash_causal_kernel, tq=tq, tk=tk, scale=scale)
    return pl.pallas_call(
        kernel,
        out_shape=jax.ShapeDtypeStruct((BH, T, Dh), q.dtype),
        grid_spec=pltpu.PrefetchScalarGridSpec(
            num_scalar_prefetch=0,
            grid=grid,
            in_specs=[
                pl.BlockSpec((1, tq, Dh), lambda bh, qi, ki: (bh, qi, 0)),
                pl.BlockSpec((1, tk, Dh), lambda bh, qi, ki: (bh, ki, 0)),
                pl.BlockSpec((1, tk, Dh), lambda bh, qi, ki: (bh, ki, 0)),
            ],
            out_specs=pl.BlockSpec((1, tq, Dh), lambda bh, qi, ki: (bh, qi, 0)),
            scratch_shapes=[
                pltpu.VMEM((1, tq, 1), jnp.float32),   # running max
                pltpu.VMEM((1, tq, 1), jnp.float32),   # running denom
                pltpu.VMEM((1, tq, Dh), jnp.float32),  # accumulator
            ],
        ),
        compiler_params=pltpu.CompilerParams(
            dimension_semantics=("parallel", "parallel", "arbitrary")),
    )(q, k, v)


# ---------------------------------------------------------------------------
# Full forward pass of CausalSelfAttention.
# ---------------------------------------------------------------------------
@functools.partial(jax.jit, static_argnames=("heads",))
def causal_self_attention(x, w_qkv, w_proj, *, heads):
    """x: (B, T, C); w_qkv: (C, 3C); w_proj: (C, C)."""
    B, T, C = x.shape
    hd = C // heads

    # TODO(synk): Butterfly(dim, 3*dim) structured factorization is represented here by an
    # equivalent dense linear map (its forward effect); the butterfly factor structure itself
    # is not reproduced.
    qkv = matmul_pallas(x.reshape(B * T, C), w_qkv).reshape(B, T, 3 * C)
    q, k, v = jnp.split(qkv, 3, axis=-1)

    def to_heads(t):
        return (t.reshape(B, T, heads, hd)
                 .transpose(0, 2, 1, 3)
                 .reshape(B * heads, T, hd))

    z = flash_causal_attention(to_heads(q), to_heads(k), to_heads(v))
    z = z.reshape(B, heads, T, hd).transpose(0, 2, 1, 3).reshape(B * T, C)

    # TODO(synk): attn_dropout / resid_dropout (p=0.2) are identity in eval-mode forward.
    out = matmul_pallas(z, w_proj).reshape(B, T, C)
    return out


# ---------------------------------------------------------------------------
# Pure-JAX reference.
# ---------------------------------------------------------------------------
def causal_self_attention_reference(x, w_qkv, w_proj, heads):
    B, T, C = x.shape
    hd = C // heads
    qkv = x.astype(jnp.float32) @ w_qkv.astype(jnp.float32)
    q, k, v = jnp.split(qkv, 3, axis=-1)
    q = q.reshape(B, T, heads, hd).transpose(0, 2, 1, 3)
    k = k.reshape(B, T, heads, hd).transpose(0, 2, 1, 3)
    v = v.reshape(B, T, heads, hd).transpose(0, 2, 1, 3)
    att = jnp.einsum("bhqd,bhkd->bhqk", q, k) / math.sqrt(hd)
    mask = jnp.tril(jnp.ones((T, T), dtype=bool))
    att = jnp.where(mask[None, None], att, -jnp.inf)
    att = jax.nn.softmax(att, axis=-1)
    z = jnp.einsum("bhqk,bhkd->bhqd", att, v)
    z = z.transpose(0, 2, 1, 3).reshape(B, T, C)
    return (z @ w_proj.astype(jnp.float32)).astype(x.dtype)


if __name__ == "__main__":
    key = jax.random.PRNGKey(0)

    # --- small shapes implied by the module: B=2, T=8, dim=32, heads=4 ---
    B, T, C, H = 2, 8, 32, 4
    k1, k2, k3, k4 = jax.random.split(key, 4)
    x = jax.random.normal(k1, (B, T, C), dtype=jnp.float32)
    w_qkv = jax.random.normal(k2, (C, 3 * C), dtype=jnp.float32) / math.sqrt(C)
    w_proj = jax.random.normal(k3, (C, C), dtype=jnp.float32) / math.sqrt(C)

    out = jax.block_until_ready(causal_self_attention(x, w_qkv, w_proj, heads=H))
    ref = causal_self_attention_reference(x, w_qkv, w_proj, H)
    assert jnp.allclose(out, ref, atol=2e-3, rtol=2e-3), "mismatch vs reference (small)"

    # --- a second shape that exercises multi-block online softmax + causal skip ---
    B2, T2, C2, H2 = 1, 512, 128, 4
    k5, k6, k7 = jax.random.split(k4, 3)
    x2 = jax.random.normal(k5, (B2, T2, C2), dtype=jnp.float32)
    w_qkv2 = jax.random.normal(k6, (C2, 3 * C2), dtype=jnp.float32) / math.sqrt(C2)
    w_proj2 = jax.random.normal(k7, (C2, C2), dtype=jnp.float32) / math.sqrt(C2)

    out2 = jax.block_until_ready(causal_self_attention(x2, w_qkv2, w_proj2, heads=H2))
    ref2 = causal_self_attention_reference(x2, w_qkv2, w_proj2, H2)
    assert jnp.allclose(out2, ref2, atol=2e-3, rtol=2e-3), "mismatch vs reference (tiled)"

    print("KERNEL_OK")
</pallas_src>

<mosaic_0001>
module attributes {stable_mosaic.version = 11 : i64} {
  func.func @_matmul_kernel(%arg0: i32, %arg1: i32, %arg2: i32, %arg3: memref<16x32xf32, #tpu.memory_space<vmem>>, %arg4: memref<32x96xf32, #tpu.memory_space<vmem>>, %arg5: memref<16x96xf32, #tpu.memory_space<vmem>>, %arg6: memref<16x96xf32, #tpu.memory_space<vmem>>) attributes {dimension_semantics = [#tpu.dimension_semantics<parallel>, #tpu.dimension_semantics<parallel>, #tpu.dimension_semantics<arbitrary>], iteration_bounds = array<i64: 1, 1, 1>, scalar_prefetch = 0 : i64, scratch_operands = 1 : i64, tpu.core_type = #tpu.core_type<tc>, window_params = [{transform_indices = @transform_0, window_bounds = array<i64: 16, 32>}, {transform_indices = @transform_1, window_bounds = array<i64: 32, 96>}, {transform_indices = @transform_2, window_bounds = array<i64: 16, 96>}]} {
    %c0_i32 = arith.constant 0 : i32
    %0 = arith.cmpi eq, %arg2, %c0_i32 : i32
    %1 = arith.extui %0 : i1 to i32
    %c0_i32_0 = arith.constant 0 : i32
    %2 = arith.cmpi ne, %1, %c0_i32_0 : i32
    scf.if %2 {
      %cst_10 = arith.constant 0.000000e+00 : f32
      %12 = vector.broadcast %cst_10 : f32 to vector<16x96xf32>
      %c0_11 = arith.constant 0 : index
      %c0_12 = arith.constant 0 : index
      %13 = vector.load %arg6[%c0_11, %c0_12] : memref<16x96xf32, #tpu.memory_space<vmem>>, vector<16x96xf32>
      tpu.vector_store %arg6[%c0_11, %c0_12], %12 {strides = array<i32>} : memref<16x96xf32, #tpu.memory_space<vmem>>, vector<16x96xf32>,
    } else {
    }
    %c0 = arith.constant 0 : index
    %c0_1 = arith.constant 0 : index
    %3 = vector.load %arg6[%c0, %c0_1] : memref<16x96xf32, #tpu.memory_space<vmem>>, vector<16x96xf32>
    %c0_2 = arith.constant 0 : index
    %c0_3 = arith.constant 0 : index
    %4 = vector.load %arg3[%c0_2, %c0_3] : memref<16x32xf32, #tpu.memory_space<vmem>>, vector<16x32xf32>
    %c0_4 = arith.constant 0 : index
    %c0_5 = arith.constant 0 : index
    %5 = vector.load %arg4[%c0_4, %c0_5] : memref<32x96xf32, #tpu.memory_space<vmem>>, vector<32x96xf32>
    %cst = arith.constant dense<0.000000e+00> : vector<16x96xf32>
    %6 = tpu.matmul %4, %5, %cst {dimension_numbers = #tpu.dot_dimension_numbers<[1], [0], [0], [1], [0, 0, 1, 1], [], []>} : vector<16x32xf32>, vector<32x96xf32>, vector<16x96xf32> -> vector<16x96xf32>
    %7 = arith.addf %3, %6 : vector<16x96xf32>
    %c0_6 = arith.constant 0 : index
    %c0_7 = arith.constant 0 : index
    %8 = vector.load %arg6[%c0_6, %c0_7] : memref<16x96xf32, #tpu.memory_space<vmem>>, vector<16x96xf32>
    tpu.vector_store %arg6[%c0_6, %c0_7], %7 {strides = array<i32>} : memref<16x96xf32, #tpu.memory_space<vmem>>, vector<16x96xf32>,
    %c0_i32_8 = arith.constant 0 : i32
    %9 = arith.cmpi eq, %arg2, %c0_i32_8 : i32
    %10 = arith.extui %9 : i1 to i32
    %c0_i32_9 = arith.constant 0 : i32
    %11 = arith.cmpi ne, %10, %c0_i32_9 : i32
    scf.if %11 {
      %c0_10 = arith.constant 0 : index
      %c0_11 = arith.constant 0 : index
      %12 = vector.load %arg6[%c0_10, %c0_11] : memref<16x96xf32, #tpu.memory_space<vmem>>, vector<16x96xf32>
      %c0_12 = arith.constant 0 : index
      %c0_13 = arith.constant 0 : index
      %13 = vector.load %arg5[%c0_12, %c0_13] : memref<16x96xf32, #tpu.memory_space<vmem>>, vector<16x96xf32>
      tpu.vector_store %arg5[%c0_12, %c0_13], %12 {strides = array<i32>} : memref<16x96xf32, #tpu.memory_space<vmem>>, vector<16x96xf32>,
    } else {
    }
    return
  }
  func.func @transform_0(%arg0: i32, %arg1: i32, %arg2: i32) -> (i32, i32) {
    %c0_i32 = arith.constant 0 : i32
    return %arg0, %arg2 : i32, i32
  }
  func.func @transform_1(%arg0: i32, %arg1: i32, %arg2: i32) -> (i32, i32) {
    %c0_i32 = arith.constant 0 : i32
    return %arg2, %arg1 : i32, i32
  }
  func.func @transform_2(%arg0: i32, %arg1: i32, %arg2: i32) -> (i32, i32) {
    %c0_i32 = arith.constant 0 : i32
    return %arg0, %arg1 : i32, i32
  }
}

module attributes {stable_mosaic.version = 11 : i64} {
  func.func @_flash_causal_kernel(%arg0: i32, %arg1: i32, %arg2: i32, %arg3: memref<1x8x8xf32, #tpu.memory_space<vmem>>, %arg4: memref<1x8x8xf32, #tpu.memory_space<vmem>>, %arg5: memref<1x8x8xf32, #tpu.memory_space<vmem>>, %arg6: memref<1x8x8xf32, #tpu.memory_space<vmem>>, %arg7: memref<1x8x1xf32, #tpu.memory_space<vmem>>, %arg8: memref<1x8x1xf32, #tpu.memory_space<vmem>>, %arg9: memref<1x8x8xf32, #tpu.memory_space<vmem>>) attributes {dimension_semantics = [#tpu.dimension_semantics<parallel>, #tpu.dimension_semantics<parallel>, #tpu.dimension_semantics<arbitrary>], iteration_bounds = array<i64: 8, 1, 1>, scalar_prefetch = 0 : i64, scratch_operands = 3 : i64, tpu.core_type = #tpu.core_type<tc>, window_params = [{transform_indices = @transform_0, window_bounds = array<i64: 1, 8, 8>}, {transform_indices = @transform_1, window_bounds = array<i64: 1, 8, 8>}, {transform_indices = @transform_2, window_bounds = array<i64: 1, 8, 8>}, {transform_indices = @transform_3, window_bounds = array<i64: 1, 8, 8>}]} {
    %c0_i32 = arith.constant 0 : i32
    %0 = arith.cmpi eq, %arg2, %c0_i32 : i32
    %1 = arith.extui %0 : i1 to i32
    %c0_i32_0 = arith.constant 0 : i32
    %2 = arith.cmpi ne, %1, %c0_i32_0 : i32
    scf.if %2 {
      %cst = arith.constant 0xFF800000 : f32
      %12 = vector.broadcast %cst : f32 to vector<1x8x1xf32>
      %c0 = arith.constant 0 : index
      %c0_5 = arith.constant 0 : index
      %c0_6 = arith.constant 0 : index
      %13 = vector.load %arg7[%c0, %c0_5, %c0_6] : memref<1x8x1xf32, #tpu.memory_space<vmem>>, vector<1x8x1xf32>
      tpu.vector_store %arg7[%c0, %c0_5, %c0_6], %12 {strides = array<i32>} : memref<1x8x1xf32, #tpu.memory_space<vmem>>, vector<1x8x1xf32>,
      %cst_7 = arith.constant 0.000000e+00 : f32
      %14 = vector.broadcast %cst_7 : f32 to vector<1x8x1xf32>
      %c0_8 = arith.constant 0 : index
      %c0_9 = arith.constant 0 : index
      %c0_10 = arith.constant 0 : index
      %15 = vector.load %arg8[%c0_8, %c0_9, %c0_10] : memref<1x8x1xf32, #tpu.memory_space<vmem>>, vector<1x8x1xf32>
      tpu.vector_store %arg8[%c0_8, %c0_9, %c0_10], %14 {strides = array<i32>} : memref<1x8x1xf32, #tpu.memory_space<vmem>>, vector<1x8x1xf32>,
      %cst_11 = arith.constant 0.000000e+00 : f32
      %16 = vector.broadcast %cst_11 : f32 to vector<1x8x8xf32>
      %c0_12 = arith.constant 0 : index
      %c0_13 = arith.constant 0 : index
      %c0_14 = arith.constant 0 : index
      %17 = vector.load %arg9[%c0_12, %c0_13, %c0_14] : memref<1x8x8xf32, #tpu.memory_space<vmem>>, vector<1x8x8xf32>
      tpu.vector_store %arg9[%c0_12, %c0_13, %c0_14], %16 {strides = array<i32>} : memref<1x8x8xf32, #tpu.memory_space<vmem>>, vector<1x8x8xf32>,
    } else {
    }
    %c8_i32 = arith.constant 8 : i32
    %3 = arith.muli %arg2, %c8_i32 : i32
    %c8_i32_1 = arith.constant 8 : i32
    %4 = arith.muli %arg1, %c8_i32_1 : i32
    %c7_i32 = arith.constant 7 : i32
    %5 = arith.addi %4, %c7_i32 : i32
    %6 = arith.cmpi sle, %3, %5 : i32
    %7 = arith.extui %6 : i1 to i32
    %c0_i32_2 = arith.constant 0 : i32
    %8 = arith.cmpi ne, %7, %c0_i32_2 : i32
    scf.if %8 {
      %c0 = arith.constant 0 : index
      %c0_5 = arith.constant 0 : index
      %c0_6 = arith.constant 0 : index
      %12 = vector.load %arg3[%c0, %c0_5, %c0_6] : memref<1x8x8xf32, #tpu.memory_space<vmem>>, vector<1x8x8xf32>
      %c0_7 = arith.constant 0 : index
      %c0_8 = arith.constant 0 : index
      %c0_9 = arith.constant 0 : index
      %13 = vector.load %arg4[%c0_7, %c0_8, %c0_9] : memref<1x8x8xf32, #tpu.memory_space<vmem>>, vector<1x8x8xf32>
      "tpu.trace_start"() <{level = 10 : i32, message = "bqd,bkd->bqk"}> : () -> ()
      %cst = arith.constant dense<0.000000e+00> : vector<1x8x8xf32>
      %14 = tpu.matmul %12, %13, %cst {dimension_numbers = #tpu.dot_dimension_numbers<[2], [2], [1], [1], [0, 0, 0, 1, 1, 1], [0], [0]>} : vector<1x8x8xf32>, vector<1x8x8xf32>, vector<1x8x8xf32> -> vector<1x8x8xf32>
      "tpu.trace_stop"() : () -> ()
      %cst_10 = arith.constant 0.353553385 : f32
      %15 = vector.broadcast %cst_10 : f32 to vector<1x8x8xf32>
      %16 = arith.mulf %14, %15 : vector<1x8x8xf32>
      %c8_i32_11 = arith.constant 8 : i32
      %17 = arith.muli %arg1, %c8_i32_11 : i32
      %18 = tpu.iota {dimensions = array<i32: 0>} : vector<8x8xi32>
      %19 = vector.broadcast %17 : i32 to vector<8x8xi32>
      %20 = arith.addi %19, %18 : vector<8x8xi32>
      %c8_i32_12 = arith.constant 8 : i32
      %21 = arith.muli %arg2, %c8_i32_12 : i32
      %22 = tpu.iota {dimensions = array<i32: 1>} : vector<8x8xi32>
      %23 = vector.broadcast %21 : i32 to vector<8x8xi32>
      %24 = arith.addi %23, %22 : vector<8x8xi32>
      %25 = arith.cmpi sge, %20, %24 : vector<8x8xi32>
      %26 = vector.shape_cast %25 : vector<8x8xi1> to vector<1x8x8xi1>
      %cst_13 = arith.constant -1.000000e+30 : f32
      %27 = vector.broadcast %cst_13 : f32 to vector<1x8x8xf32>
      %28 = arith.select %26, %16, %27 : vector<1x8x8xi1>, vector<1x8x8xf32>
      %c0_14 = arith.constant 0 : index
      %c0_15 = arith.constant 0 : index
      %c0_16 = arith.constant 0 : index
      %29 = vector.load %arg7[%c0_14, %c0_15, %c0_16] : memref<1x8x1xf32, #tpu.memory_space<vmem>>, vector<1x8x1xf32>
      %cst_17 = arith.constant dense<0xFF800000> : vector<1x8xf32>
      %30 = vector.multi_reduction <maximumf>, %28, %cst_17 [2] : vector<1x8x8xf32> to vector<1x8xf32>
      %31 = vector.shape_cast %30 : vector<1x8xf32> to vector<1x8x1xf32>
      %32 = arith.maximumf %29, %31 : vector<1x8x1xf32>
      %33 = arith.subf %29, %32 : vector<1x8x1xf32>
      %34 = math.exp %33 : vector<1x8x1xf32>
      %35 = vector.broadcast %32 : vector<1x8x1xf32> to vector<1x8x8xf32>
      %36 = arith.subf %28, %35 : vector<1x8x8xf32>
      %37 = math.exp %36 : vector<1x8x8xf32>
      %c0_18 = arith.constant 0 : index
      %c0_19 = arith.constant 0 : index
      %c0_20 = arith.constant 0 : index
      %38 = vector.load %arg8[%c0_18, %c0_19, %c0_20] : memref<1x8x1xf32, #tpu.memory_space<vmem>>, vector<1x8x1xf32>
      %39 = arith.mulf %34, %38 : vector<1x8x1xf32>
      %cst_21 = arith.constant dense<0.000000e+00> : vector<1x8xf32>
      %40 = vector.multi_reduction <add>, %37, %cst_21 [2] : vector<1x8x8xf32> to vector<1x8xf32>
      %41 = vector.shape_cast %40 : vector<1x8xf32> to vector<1x8x1xf32>
      %42 = arith.addf %39, %41 : vector<1x8x1xf32>
      %c0_22 = arith.constant 0 : index
      %c0_23 = arith.constant 0 : index
      %c0_24 = arith.constant 0 : index
      %43 = vector.load %arg8[%c0_22, %c0_23, %c0_24] : memref<1x8x1xf32, #tpu.memory_space<vmem>>, vector<1x8x1xf32>
      tpu.vector_store %arg8[%c0_22, %c0_23, %c0_24], %42 {strides = array<i32>} : memref<1x8x1xf32, #tpu.memory_space<vmem>>, vector<1x8x1xf32>,
      %c0_25 = arith.constant 0 : index
      %c0_26 = arith.constant 0 : index
      %c0_27 = arith.constant 0 : index
      %44 = vector.load %arg9[%c0_25, %c0_26, %c0_27] : memref<1x8x8xf32, #tpu.memory_space<vmem>>, vector<1x8x8xf32>
      %45 = vector.broadcast %34 : vector<1x8x1xf32> to vector<1x8x8xf32>
      %46 = arith.mulf %45, %44 : vector<1x8x8xf32>
      %c0_28 = arith.constant 0 : index
      %c0_29 = arith.constant 0 : index
      %c0_30 = arith.constant 0 : index
      %47 = vector.load %arg5[%c0_28, %c0_29, %c0_30] : memref<1x8x8xf32, #tpu.memory_space<vmem>>, vector<1x8x8xf32>
      "tpu.trace_start"() <{level = 10 : i32, message = "bqk,bkd->bqd"}> : () -> ()
      %cst_31 = arith.constant dense<0.000000e+00> : vector<1x8x8xf32>
      %48 = tpu.matmul %37, %47, %cst_31 {dimension_numbers = #tpu.dot_dimension_numbers<[2], [1], [1], [2], [0, 0, 0, 1, 1, 2], [0], [0]>} : vector<1x8x8xf32>, vector<1x8x8xf32>, vector<1x8x8xf32> -> vector<1x8x8xf32>
      "tpu.trace_stop"() : () -> ()
      %49 = arith.addf %46, %48 : vector<1x8x8xf32>
      %c0_32 = arith.constant 0 : index
      %c0_33 = arith.constant 0 : index
      %c0_34 = arith.constant 0 : index
      %50 = vector.load %arg9[%c0_32, %c0_33, %c0_34] : memref<1x8x8xf32, #tpu.memory_space<vmem>>, vector<1x8x8xf32>
      tpu.vector_store %arg9[%c0_32, %c0_33, %c0_34], %49 {strides = array<i32>} : memref<1x8x8xf32, #tpu.memory_space<vmem>>, vector<1x8x8xf32>,
      %c0_35 = arith.constant 0 : index
      %c0_36 = arith.constant 0 : index
      %c0_37 = arith.constant 0 : index
      %51 = vector.load %arg7[%c0_35, %c0_36, %c0_37] : memref<1x8x1xf32, #tpu.memory_space<vmem>>, vector<1x8x1xf32>
      tpu.vector_store %arg7[%c0_35, %c0_36, %c0_37], %32 {strides = array<i32>} : memref<1x8x1xf32, #tpu.memory_space<vmem>>, vector<1x8x1xf32>,
    } else {
    }
    %c0_i32_3 = arith.constant 0 : i32
    %9 = arith.cmpi eq, %arg2, %c0_i32_3 : i32
    %10 = arith.extui %9 : i1 to i32
    %c0_i32_4 = arith.constant 0 : i32
    %11 = arith.cmpi ne, %10, %c0_i32_4 : i32
    scf.if %11 {
      %c0 = arith.constant 0 : index
      %c0_5 = arith.constant 0 : index
      %c0_6 = arith.constant 0 : index
      %12 = vector.load %arg9[%c0, %c0_5, %c0_6] : memref<1x8x8xf32, #tpu.memory_space<vmem>>, vector<1x8x8xf32>
      %c0_7 = arith.constant 0 : index
      %c0_8 = arith.constant 0 : index
      %c0_9 = arith.constant 0 : index
      %13 = vector.load %arg8[%c0_7, %c0_8, %c0_9] : memref<1x8x1xf32, #tpu.memory_space<vmem>>, vector<1x8x1xf32>
      %14 = vector.broadcast %13 : vector<1x8x1xf32> to vector<1x8x8xf32>
      %15 = arith.divf %12, %14 : vector<1x8x8xf32>
      %c0_10 = arith.constant 0 : index
      %c0_11 = arith.constant 0 : index
      %c0_12 = arith.constant 0 : index
      %16 = vector.load %arg6[%c0_10, %c0_11, %c0_12] : memref<1x8x8xf32, #tpu.memory_space<vmem>>, vector<1x8x8xf32>
      tpu.vector_store %arg6[%c0_10, %c0_11, %c0_12], %15 {strides = array<i32>} : memref<1x8x8xf32, #tpu.memory_space<vmem>>, vector<1x8x8xf32>,
    } else {
    }
    return
  }
  func.func @transform_0(%arg0: i32, %arg1: i32, %arg2: i32) -> (i32, i32, i32) {
    %c0_i32 = arith.constant 0 : i32
    %c0_i32_0 = arith.constant 0 : i32
    return %arg0, %arg1, %c0_i32 : i32, i32, i32
  }
  func.func @transform_1(%arg0: i32, %arg1: i32, %arg2: i32) -> (i32, i32, i32) {
    %c0_i32 = arith.constant 0 : i32
    %c0_i32_0 = arith.constant 0 : i32
    return %arg0, %arg2, %c0_i32 : i32, i32, i32
  }
  func.func @transform_2(%arg0: i32, %arg1: i32, %arg2: i32) -> (i32, i32, i32) {
    %c0_i32 = arith.constant 0 : i32
    %c0_i32_0 = arith.constant 0 : i32
    return %arg0, %arg2, %c0_i32 : i32, i32, i32
  }
  func.func @transform_3(%arg0: i32, %arg1: i32, %arg2: i32) -> (i32, i32, i32) {
    %c0_i32 = arith.constant 0 : i32
    %c0_i32_0 = arith.constant 0 : i32
    return %arg0, %arg1, %c0_i32 : i32, i32, i32
  }
}

module attributes {stable_mosaic.version = 11 : i64} {
  func.func @_matmul_kernel(%arg0: i32, %arg1: i32, %arg2: i32, %arg3: memref<16x32xf32, #tpu.memory_space<vmem>>, %arg4: memref<32x32xf32, #tpu.memory_space<vmem>>, %arg5: memref<16x32xf32, #tpu.memory_space<vmem>>, %arg6: memref<16x32xf32, #tpu.memory_space<vmem>>) attributes {dimension_semantics = [#tpu.dimension_semantics<parallel>, #tpu.dimension_semantics<parallel>, #tpu.dimension_semantics<arbitrary>], iteration_bounds = array<i64: 1, 1, 1>, scalar_prefetch = 0 : i64, scratch_operands = 1 : i64, tpu.core_type = #tpu.core_type<tc>, window_params = [{transform_indices = @transform_0, window_bounds = array<i64: 16, 32>}, {transform_indices = @transform_1, window_bounds = array<i64: 32, 32>}, {transform_indices = @transform_2, window_bounds = array<i64: 16, 32>}]} {
    %c0_i32 = arith.constant 0 : i32
    %0 = arith.cmpi eq, %arg2, %c0_i32 : i32
    %1 = arith.extui %0 : i1 to i32
    %c0_i32_0 = arith.constant 0 : i32
    %2 = arith.cmpi ne, %1, %c0_i32_0 : i32
    scf.if %2 {
      %cst_10 = arith.constant 0.000000e+00 : f32
      %12 = vector.broadcast %cst_10 : f32 to vector<16x32xf32>
      %c0_11 = arith.constant 0 : index
      %c0_12 = arith.constant 0 : index
      %13 = vector.load %arg6[%c0_11, %c0_12] : memref<16x32xf32, #tpu.memory_space<vmem>>, vector<16x32xf32>
      tpu.vector_store %arg6[%c0_11, %c0_12], %12 {strides = array<i32>} : memref<16x32xf32, #tpu.memory_space<vmem>>, vector<16x32xf32>,
    } else {
    }
    %c0 = arith.constant 0 : index
    %c0_1 = arith.constant 0 : index
    %3 = vector.load %arg6[%c0, %c0_1] : memref<16x32xf32, #tpu.memory_space<vmem>>, vector<16x32xf32>
    %c0_2 = arith.constant 0 : index
    %c0_3 = arith.constant 0 : index
    %4 = vector.load %arg3[%c0_2, %c0_3] : memref<16x32xf32, #tpu.memory_space<vmem>>, vector<16x32xf32>
    %c0_4 = arith.constant 0 : index
    %c0_5 = arith.constant 0 : index
    %5 = vector.load %arg4[%c0_4, %c0_5] : memref<32x32xf32, #tpu.memory_space<vmem>>, vector<32x32xf32>
    %cst = arith.constant dense<0.000000e+00> : vector<16x32xf32>
    %6 = tpu.matmul %4, %5, %cst {dimension_numbers = #tpu.dot_dimension_numbers<[1], [0], [0], [1], [0, 0, 1, 1], [], []>} : vector<16x32xf32>, vector<32x32xf32>, vector<16x32xf32> -> vector<16x32xf32>
    %7 = arith.addf %3, %6 : vector<16x32xf32>
    %c0_6 = arith.constant 0 : index
    %c0_7 = arith.constant 0 : index
    %8 = vector.load %arg6[%c0_6, %c0_7] : memref<16x32xf32, #tpu.memory_space<vmem>>, vector<16x32xf32>
    tpu.vector_store %arg6[%c0_6, %c0_7], %7 {strides = array<i32>} : memref<16x32xf32, #tpu.memory_space<vmem>>, vector<16x32xf32>,
    %c0_i32_8 = arith.constant 0 : i32
    %9 = arith.cmpi eq, %arg2, %c0_i32_8 : i32
    %10 = arith.extui %9 : i1 to i32
    %c0_i32_9 = arith.constant 0 : i32
    %11 = arith.cmpi ne, %10, %c0_i32_9 : i32
    scf.if %11 {
      %c0_10 = arith.constant 0 : index
      %c0_11 = arith.constant 0 : index
      %12 = vector.load %arg6[%c0_10, %c0_11] : memref<16x32xf32, #tpu.memory_space<vmem>>, vector<16x32xf32>
      %c0_12 = arith.constant 0 : index
      %c0_13 = arith.constant 0 : index
      %13 = vector.load %arg5[%c0_12, %c0_13] : memref<16x32xf32, #tpu.memory_space<vmem>>, vector<16x32xf32>
      tpu.vector_store %arg5[%c0_12, %c0_13], %12 {strides = array<i32>} : memref<16x32xf32, #tpu.memory_space<vmem>>, vector<16x32xf32>,
    } else {
    }
    return
  }
  func.func @transform_0(%arg0: i32, %arg1: i32, %arg2: i32) -> (i32, i32) {
    %c0_i32 = arith.constant 0 : i32
    return %arg0, %arg2 : i32, i32
  }
  func.func @transform_1(%arg0: i32, %arg1: i32, %arg2: i32) -> (i32, i32) {
    %c0_i32 = arith.constant 0 : i32
    return %arg2, %arg1 : i32, i32
  }
  func.func @transform_2(%arg0: i32, %arg1: i32, %arg2: i32) -> (i32, i32) {
    %c0_i32 = arith.constant 0 : i32
    return %arg0, %arg1 : i32, i32
  }
}

</mosaic_0001>

<bundles_post_ra>
// kernel: causal_self_attention.3
= control target key start
LH: loop header
LB: loop body
LE: loop exit
PB: predicated region body
PF: predicated region fallthrough
CT: control target
= control target key end

     0   :  { %7 = vsyncpa [#allocation4], 0  ;;  %s262_s0 = inlined_call_operand.hbm [shape: f32[16,32], index: 0, kind: input, shape index: {}]   ;;  %s263_s1 = inlined_call_operand.hbm [shape: f32[32,96], index: 1, kind: input, shape index: {}]   ;;  %s264_s2 = inlined_call_operand.vmem [shape: f32[16,96], index: 2, kind: output, shape index: {}]  }
   0x1   :  { %8 = vsyncpa [#allocation6], 0  ;;  %s222_s9 = smov [#allocation3]  }
   0x2   :  { %s14_s10 = sshll.u32 %s222_s9, 4  ;;  %s15_s10 = int_to_ptr.vmem [resolvable:$true] %s14_s10 }
   0x3   :  { %s186_s11 = scalar_lea.vmem %s15_s10, 256  ;;  %p191_p1 = scmp.lt.s32.totalorder %s15_s10, %s15_s10 }
   0x4   :  { %p187_p0 = scmp.ne.s32.totalorder %s15_s10, %s186_s11  ;;  %p192_p2 = scmp.lt.s32.totalorder %s186_s11, %s186_s11 }
   0x6   :  { %p193_p3 = por %p192_p2, %p191_p1 }
   0x8   :  { %p194_p4 = pnand %p193_p3, %p187_p0 }
   0xa   :  { %197 = shalt.err (!%p194_p4)
}
   0xb   :  { %s223_s12 = smov 128   ;;  %s224_s13 = smov 8  }
   0xc   :  { %20 = dma.hbm_to_vmem [thread:$0]  %s262_s0, 256, %s15_s10, [#allocation4], %s223_s12, %s223_s12, %s224_s13  }
   0xd   :  { %s225_s16 = smov [#allocation5]  }
   0xe   :  { %s26_s17 = sshll.u32 %s225_s16, 4  ;;  %s27_s17 = int_to_ptr.vmem [resolvable:$true] %s26_s17 }
   0xf   :  { %s206_s18 = scalar_lea.vmem %s27_s17, 512  ;;  %p211_p6 = scmp.lt.s32.totalorder %s27_s17, %s27_s17 }
  0x10   :  { %p207_p5 = scmp.ne.s32.totalorder %s27_s17, %s206_s18  ;;  %p212_p7 = scmp.lt.s32.totalorder %s206_s18, %s206_s18 }
  0x12   :  { %p213_p8 = por %p212_p7, %p211_p6 }
  0x14   :  { %p214_p9 = pnand %p213_p8, %p207_p5 }
  0x16   :  { %217 = shalt.err (!%p214_p9)
}
  0x17   :  { %32 = dma.hbm_to_vmem [thread:$0]  %s263_s1, 512, %s27_s17, [#allocation6], %s223_s12, %s223_s12, %s224_s13  }
  0x18   :  { %218 = dma.done.wait [#allocation4], 256  }
  0x19   :  { %219 = vsyncadd [#allocation4], 4294967040 }
  0x1a   :  { %220 = dma.done.wait [#allocation6], 512  }
  0x1b   :  { %221 = vsyncadd [#allocation6], 4294966784  ;;  %vm43_vm0 = vcmask 785408   ;;  %v226_v0 = vmov 0.0   ;;  %vm54_vm1 = vcmask 261120   ;;  %v53_v1 = vld [vmem:[#allocation5 + $0x18] sm:$0xff] }
  0x1c   :  { %45 = vst.msk [vmem:[#allocation2 + $0x8] sm:$0xff] %vm43_vm0, %v226_v0  ;;  %44 = vst.msk [vmem:[#allocation2] sm:$0xff] %vm43_vm0, %v226_v0  ;;  %v52_v2 = vld [vmem:[#allocation5 + $0x10] sm:$0xff]  ;;  %162 = vmatprep.subr.mxu0 %v53_v1  ;;  %v51_v4 = vld [vmem:[#allocation5 + $0x8] sm:$0xff] }
  0x1d   :  { %v48_v3 = vld [vmem:[#allocation3] sm:$0xff]  ;;  %163 = vmatpush3.msra.mxu0 %v53_v1  ;;  %v50_v5 = vld [vmem:[#allocation5] sm:$0xff]  ;;  %v49_v6 = vld [vmem:[#allocation3 + $0x8] sm:$0xff] }
  0x1e   :  { %170 = vmatprep.mubr.msk.f32.mxu0 %vm54_vm1, %v48_v3  ;;  %164 = vmatprep.subr.mxu0 %v52_v2 }
  0x1f   :  { %165 = vmatpush3.msra.mxu0 %v52_v2 }
  0x20   :  { %166 = vmatprep.subr.mxu0 %v51_v4 }
  0x21   :  { %167 = vmatpush3.msra.mxu0 %v51_v4 }
  0x22   :  { %168 = vmatprep.subr.mxu0 %v50_v5 }
  0x23   :  { %169 = vmatpush3.msra.mxu0 %v50_v5  ;;  %v47_v7 = vld [vmem:[#allocation2 + $0x8] sm:$0xff]  ;;  %v46_v9 = vld [vmem:[#allocation2] sm:$0xff] }
  0x24   :  { %171 = vmatmul.mubr.msk.f32.vlgmr.msra.gmra.mxu0 %vm54_vm1, %v49_v6 }
  0xe4   :  { %v172_v8 = vpop.f32.mrf.mxu0 }
  0xe5   :  { %v137_v10 = vadd.f32 %v172_v8, %v47_v7 }
  0xe6   :  { %v127_v11 = vpop.f32.mrf.mxu0 }
  0xe7   :  { %140 = vst.msk [vmem:[#allocation2 + $0x8] sm:$0xff] %vm43_vm0, %v137_v10  ;;  %v136_v12 = vadd.f32 %v127_v11, %v46_v9 }
  0xe9   :  { %139 = vst.msk [vmem:[#allocation2] sm:$0xff] %vm43_vm0, %v136_v12 }
  0xee   :  { %v145_v13 = vld [vmem:[#allocation2 + $0x8] sm:$0xff] }
  0xef   :  { %147 = vst.msk [vmem:[%s264_s2 + $0x8] sm:$0xff] %vm43_vm0, %v145_v13 }
  0xf0   :  { %v144_v14 = vld [vmem:[#allocation2] sm:$0xff] }
  0xf1   :  { %146 = vst.msk [vmem:[%s264_s2] sm:$0xff] %vm43_vm0, %v144_v14 }
  0xf2   :  { %152 = vsyncpa [#allocation4], 1 }
  0xf3   :  { %153 = vsyncpa [#allocation6], 1 }

// kernel: causal_self_attention.5
= control target key start
LH: loop header
LB: loop body
LE: loop exit
PB: predicated region body
PF: predicated region fallthrough
CT: control target
= control target key end

     0   :  { %vm16_vm0 = vcmask 261120   ;;  %v181_v3 = vmov 0.0   ;;  %s229_s0 = inlined_call_operand.vmem [shape: f32[16,32], index: 0, kind: input, shape index: {}]   ;;  %s230_s1 = inlined_call_operand.vmem [shape: f32[32,32], index: 1, kind: input, shape index: {}]   ;;  %s231_s2 = inlined_call_operand.hbm [shape: f32[16,32], index: 2, kind: output, shape index: {}]  }
   0x1   :  { %v26_v0 = vld [vmem:[%s230_s1 + $0x18] sm:$0xff]  ;;  %v25_v1 = vld [vmem:[%s230_s1 + $0x10] sm:$0xff]  ;;  %v21_v2 = vld [vmem:[%s229_s0] sm:$0xff]  ;;  %18 = vst.msk [vmem:[#allocation2 + $0x8] sm:$0xff] %vm16_vm0, %v181_v3 }
   0x2   :  { %144 = vmatprep.subr.mxu0 %v26_v0  ;;  %17 = vst.msk [vmem:[#allocation2] sm:$0xff] %vm16_vm0, %v181_v3  ;;  %v24_v4 = vld [vmem:[%s230_s1 + $0x8] sm:$0xff]  ;;  %152 = vmatprep.mubr.msk.f32.mxu0 %vm16_vm0, %v21_v2 }
   0x3   :  { %145 = vmatpush3.msra.mxu0 %v26_v0 }
   0x4   :  { %7 = vsyncpa [#allocation4], 0  ;;  %146 = vmatprep.subr.mxu0 %v25_v1  ;;  %v23_v5 = vld [vmem:[%s230_s1] sm:$0xff]  ;;  %v22_v6 = vld [vmem:[%s229_s0 + $0x8] sm:$0xff]  ;;  %s182_s1 = smov [#allocation3]  }
   0x5   :  { %147 = vmatpush3.msra.mxu0 %v25_v1  ;;  %s125_s21 = sshll.u32 %s182_s1, 4  ;;  %s126_s21 = int_to_ptr.vmem [resolvable:$true] %s125_s21 }
   0x6   :  { %148 = vmatprep.subr.mxu0 %v24_v4  ;;  %s159_s0 = scalar_lea.vmem %s126_s21, 256  ;;  %p164_p1 = scmp.lt.s32.totalorder %s126_s21, %s126_s21 }
   0x7   :  { %149 = vmatpush3.msra.mxu0 %v24_v4  ;;  %p160_p0 = scmp.ne.s32.totalorder %s126_s21, %s159_s0  ;;  %p165_p2 = scmp.lt.s32.totalorder %s159_s0, %s159_s0 }
   0x8   :  { %150 = vmatprep.subr.mxu0 %v23_v5  ;;  %v20_v7 = vld [vmem:[#allocation2 + $0x8] sm:$0xff] }
   0x9   :  { %151 = vmatpush3.msra.mxu0 %v23_v5  ;;  %v19_v9 = vld [vmem:[#allocation2] sm:$0xff]  ;;  %p166_p3 = por %p165_p2, %p164_p1 }
   0xa   :  { %153 = vmatmul.mubr.msk.f32.vlgmr.msra.gmra.mxu0 %vm16_vm0, %v22_v6 }
   0xb   :  { %p167_p4 = pnand %p166_p3, %p160_p0 }
  0xca   :  { %v154_v8 = vpop.f32.mrf.mxu0 }
  0xcb   :  { %v110_v10 = vadd.f32 %v154_v8, %v20_v7 }
  0xcc   :  { %v100_v11 = vpop.f32.mrf.mxu0 }
  0xcd   :  { %112 = vst.msk [vmem:[#allocation2 + $0x8] sm:$0xff] %vm16_vm0, %v110_v10  ;;  %v109_v12 = vadd.f32 %v100_v11, %v19_v9 }
  0xcf   :  { %111 = vst.msk [vmem:[#allocation2] sm:$0xff] %vm16_vm0, %v109_v12 }
  0xd4   :  { %v117_v13 = vld [vmem:[#allocation2 + $0x8] sm:$0xff] }
  0xd5   :  { %119 = vst.msk [vmem:[#allocation3 + $0x8] sm:$0xff] %vm16_vm0, %v117_v13 }
  0xd6   :  { %v116_v14 = vld [vmem:[#allocation2] sm:$0xff] }
  0xd7   :  { %118 = vst.msk [vmem:[#allocation3] sm:$0xff] %vm16_vm0, %v116_v14 }
  0xd8   :  { %170 = shalt.err (!%p167_p4)
}
  0xd9   :  { %s183_s22 = smov 128   ;;  %s184_s23 = smov 8  }
  0xda   :  { %131 = dma.vmem_to_hbm [thread:$0]  %s126_s21, 256, %s231_s2, [#allocation4], %s183_s22, %s183_s22, %s184_s23  }
  0xdb   :  { %179 = dma.done.wait [#allocation4], 256  }
  0xdc   :  { %180 = vsyncadd [#allocation4], 4294967040 }
  0xdd   :  { %135 = vsyncpa [#allocation4], 1 }

// kernel: causal_self_attention.4
= control target key start
LH: loop header
LB: loop body
LE: loop exit
PB: predicated region body
PF: predicated region fallthrough
CT: control target
= control target key end

     0   :  { %s707_s12 = smov 0   ;;  %s709_s13 = smov 0   ;;  %s764_s0 = inlined_call_operand.vmem [shape: f32[8,8,8], index: 0, kind: input, shape index: {}]   ;;  %s765_s1 = inlined_call_operand.vmem [shape: f32[8,8,8], index: 1, kind: input, shape index: {}]   ;;  %s766_s2 = inlined_call_operand.vmem [shape: f32[8,8,8], index: 2, kind: input, shape index: {}]   ;;  %s767_s3 = inlined_call_operand.vmem [shape: f32[8,8,8], index: 3, kind: output, shape index: {}]  }
   0x1   :  { %s711_s14 = smov 0  }
   0x2 LB: > { %s32_s15 = sadd.s32 1, %s677_s13  ;;  %p599_p0 = scmp.ge.s32.totalorder %s681_s14, 1  ;;  %s681_s14 = sphi %s711_s14, %s13_s14   ;;  %s677_s13 = sphi %s709_s13, %s769_s13   ;;  %s673_s12 = sphi %s707_s12, %s768_s12  }
   0x3   : > { %p34_p1 = scmp.ge.s32.totalorder %s32_s15, 8  ;;  %p190_p2 = scmp.lt.s32.totalorder %s681_s14, 9 }
   0x5   : > { %s771_s15 = smov (%p34_p1, %s32_s15), 0  ;;  %p191_p3 = pnand %p599_p0, %p190_p2 }
   0x6   : > { %p232_p4 = scmp.lt.s32.totalorder (!%p191_p3), %s673_s12, 7 }
   0x7   : > { %194 = sbr.rel (%p191_p3) target bundleno = 790 (0x316), region = 32 }
   0xc   : > { %vm267_vm0 = vcmask 64512   ;;  %v683_v0 = vmov 0.0   ;;  %vm684_vm1 = vmmov 0   ;;  %s773_s12 = smov (!%p232_p4, %s673_s12), 7  ;;  %vm264_vm2 = vcmask 7168  }
   0xd   : > { %613 = vmatprep.subr.mxu0 %v683_v0  ;;  %268 = vst.msk [vmem:[#allocation4] sm:$0xff] %vm267_vm0, %v683_v0  ;;  %615 = vmatprep.mubr.msk.f32.mxu0 %vm684_vm1, %v683_v0  ;;  %s726_s16 = sshll.u32 %s773_s12, 3  ;;  %v685_v3 = vmov -inf   ;;  %v356_v4 = vlaneseq  ;;  %v686_v12 = vmov 0  }
   0xe   : > { %618 = vmatprep.subr.mxu1 %v683_v0  ;;  %620 = vmatprep.mubr.msk.f32.mxu1 %vm684_vm1, %v683_v0  ;;  %s245_s19 = scalar_lea.vmem %s765_s1, %s726_s16  ;;  %s238_s22 = scalar_lea.vmem %s764_s0, %s726_s16  ;;  %265 = vst.msk [vmem:[#allocation2] sm:$0xff] %vm264_vm2, %v685_v3  ;;  %266 = vst.msk [vmem:[#allocation3] sm:$0xff] %vm264_vm2, %v683_v0 }
   0xf   : > { %v277_v1 = vld [vmem:[%s245_s19] sm:$0xff]  ;;  %v357_v5 = vshrl.u32 %v356_v4, 7  ;;  %v361_v6 = vand.u32 127, %v356_v4  ;;  %651 = vset.pattern.permute.xlu0 %v686_v12  ;;  %652 = vset.pattern.permute.xlu1 %v686_v12  ;;  %s252_s25 = scalar_lea.vmem %s766_s2, %s726_s16  ;;  %s259_s28 = scalar_lea.vmem %s767_s3, %s726_s16 }
  0x10   : > { %614 = vmatpush3.xpose.msk.msra.mxu0 %vm267_vm0, %v277_v1  ;;  %v276_v2 = vld [vmem:[%s238_s22] sm:$0xff] }
  0x11   : > { %vm364_vm3 = vcmp.ge.s32.totalorder %v357_v5, %v361_v6  ;;  %v397_v17 = vld [vmem:[%s252_s25] sm:$0xff] }
  0x12   : > { %619 = vmatpush3.msra.mxu1 %v397_v17 }
  0x13   : > { %616 = vmatmul.mubr.msk.f32.vlgmr.msra.gmra.mxu0 %vm267_vm0, %v276_v2 }
  0x14   : > { %v390_v33 = vld [vmem:[#allocation4] sm:$0xff] }
  0x15   : > { %v366_v13 = vld [vmem:[#allocation2] sm:$0xff]  ;;  %v382_v25 = vld [vmem:[#allocation3] sm:$0xff] }
  0xd3   : > { %v351_v7 = vpop.f32.mrf.mxu0 }
  0xd4   : > { %v355_v8 = vmul.f32 0.35355338, %v351_v7 }
  0xd5   : > { %v617_v9 = vpop.f32.mrf.mxu0 }
  0xd6   : > { %v365_v10 = vsel %vm364_vm3, %v355_v8, -1e+30 }
  0xd7   : > { %v367_v11 = vsel %vm267_vm0, %v365_v10, -inf }
  0xd8   : > { %368 = vmax.xlane.f32.xlu0 %v367_v11 }
 0x161   : > { %v369_v14 = vpop.xlane.xlu0 %368 }
 0x162   : > { %v370_v15 = vmax.f32 %v366_v13, %v369_v14 }
 0x164   : > { %v371_v16 = vsub.f32 %v366_v13, %v370_v15  ;;  %473 = vst.msk [vmem:[#allocation2] sm:$0xff] %vm264_vm2, %v370_v15  ;;  %376 = vperm.xlu0 %651, %v370_v15  }
 0x166   : > { %v372_v23 = vmul.f32 1.442695, %v371_v16 }
 0x1df   : > { %v377_v18 = vpop.permute.xlu0 %376 }
 0x1e0   : > { %v379_v19 = vsub.f32 %v365_v10, %v377_v18 }
 0x1e2   : > { %v380_v20 = vmul.f32 1.442695, %v379_v19 }
 0x1e4   : > { %653 = vpow2.f32 %v380_v20 }
 0x1e5   : > { %655 = vpow2.f32 %v372_v23 }
 0x1f1   : > { %v654_v21 = vpop.eup %653 }
 0x1f2   : > { %621 = vmatmul.mubr.msk.f32.vlgmr.msra.gmra.mxu1 %vm267_vm0, %v654_v21  ;;  %v384_v22 = vsel %vm267_vm0, %v654_v21, 0.0  ;;  %v656_v24 = vpop.eup %655 }
 0x1f3   : > { %385 = vadd.xlane.f32.xlu1 %v384_v22  ;;  %v383_v26 = vmul.f32 %v656_v24, %v382_v25 }
 0x27c   : > { %v386_v27 = vpop.xlane.xlu1 %385 }
 0x27d   : > { %v387_v28 = vadd.f32 %v386_v27, %v383_v26 }
 0x27f   : > { %389 = vst.msk [vmem:[#allocation3] sm:$0xff] %vm264_vm2, %v387_v28 }
 0x286   : > { %v478_v29 = vld [vmem:[#allocation3] sm:$0xff] }
 0x287   : > { %481 = vperm.xlu1 %652, %v478_v29  }
 0x28b   : > { %393 = vperm.xlu1 %652, %v656_v24  }
 0x2b2   : > { %v467_v30 = vpop.f32.mrf.mxu1 }
 0x2b4   : > { %v622_v31 = vpop.f32.mrf.mxu1 }
 0x302   : > { %v482_v32 = vpop.permute.xlu1 %481 }
 0x303   : > { %657 = vrcp.f32 %v482_v32 }
 0x306   : > { %v394_v34 = vpop.permute.xlu1 %393 }
 0x307   : > { %v396_v35 = vmul.f32 %v394_v34, %v390_v33 }
 0x309   : > { %v471_v36 = vadd.f32 %v467_v30, %v396_v35 }
 0x30b   : > { %472 = vst.msk [vmem:[#allocation4] sm:$0xff] %vm267_vm0, %v471_v36 }
 0x310   : > { %v658_v37 = vpop.eup %657 }
 0x312   : > { %v477_v38 = vld [vmem:[#allocation4] sm:$0xff] }
 0x313   : > { %v485_v39 = vmul.f32 %v658_v37, %v477_v38 }
 0x315   : > { %487 = vst.msk [vmem:[%s259_s28] sm:$0xff] %vm267_vm0, %v485_v39 }
 0x316 PF: > { %s13_s14 = sadd.s32 1, %s681_s14   ;;  %s768_s12 = smov %s677_s13 }
 0x317   : > { %p10_p5 = scmp.ge.s32.totalorder %s13_s14, 10   ;;  %s769_s13 = smov %s771_s15 }
 0x319   :  { %12 = sbr.rel (!%p10_p5) target bundleno = 2 (0x2), region = 80 }

</bundles_post_ra>
